<compile_context>
chip_gen: v5e
topology: v5e:2x2
jax: 0.10.0
libtpu: 0.0.40
codegen_flags: <defaults>
</compile_context>

<pallas_src>
import jax
import jax.numpy as jnp
from jax.experimental import pallas as pl
from jax.experimental.pallas import tpu as pltpu


def _fused_softmax_kernel(inv_ref, u_ref, i_ref, uo_ref, io_ref):
    """Row-wise softmax(x * inv_db) for both tensors in one grid step.

    inv_ref : SMEM (1,) float32  -> 1 / difficulty_balance
    u_ref   : VMEM (TB, Du) float32
    i_ref   : VMEM (TB, Di) float32
    uo_ref  : VMEM (TB, Du) float32
    io_ref  : VMEM (TB, Di) float32
    """
    inv_db = inv_ref[0]

    def _row_softmax(x):
        # softmax(x/db) == softmax((x - max(x)) / db)  (shift invariance),
        # and for db > 0 the max-shift also keeps exp() in range.
        m = jnp.max(x, axis=-1, keepdims=True)
        e = jnp.exp((x - m) * inv_db)
        s = jnp.sum(e, axis=-1, keepdims=True)
        # approx reciprocal -> EUP vrcp (free slot); ~1e-4 relative error.
        return e * pl.reciprocal(s, approx=True)

    uo_ref[...] = _row_softmax(u_ref[...])
    io_ref[...] = _row_softmax(i_ref[...])


def _choose_row_tile(B, Du, Di, vmem_budget_bytes=16 << 20):
    """Pick a row-tile size: full-batch block if it fits, else a multiple of 8
    sized against a conservative VMEM budget (safe for v7x's 64 MiB VMEM)."""
    # in + out, f32, double-buffered, for both tensors.
    bytes_per_row = 2 * 2 * 4 * (Du + Di)
    tb_max = max(8, (vmem_budget_bytes // bytes_per_row) // 8 * 8)
    if B <= tb_max:
        return B  # block == full array rows -> always a legal block shape
    return min(tb_max, 2048)


@jax.jit
def _generator_forward(user_data, item_data, difficulty_balance):
    B, Du = user_data.shape
    _, Di = item_data.shape

    # One scalar divide under jit; the kernel only sees the reciprocal.
    inv_db = jnp.reshape(
        1.0 / jnp.asarray(difficulty_balance, dtype=jnp.float32), (1,))

    TB = _choose_row_tile(B, Du, Di)
    grid = (pl.cdiv(B, TB),)

    return pl.pallas_call(
        _fused_softmax_kernel,
        out_shape=(
            jax.ShapeDtypeStruct((B, Du), jnp.float32),
            jax.ShapeDtypeStruct((B, Di), jnp.float32),
        ),
        grid_spec=pltpu.PrefetchScalarGridSpec(
            num_scalar_prefetch=0,
            grid=grid,
            in_specs=[
                pl.BlockSpec(memory_space=pltpu.SMEM),       # inv_db scalar
                pl.BlockSpec((TB, Du), lambda i: (i, 0)),    # user rows
                pl.BlockSpec((TB, Di), lambda i: (i, 0)),    # item rows
            ],
            out_specs=[
                pl.BlockSpec((TB, Du), lambda i: (i, 0)),
                pl.BlockSpec((TB, Di), lambda i: (i, 0)),
            ],
        ),
        compiler_params=pltpu.CompilerParams(
            dimension_semantics=("parallel",),               # 2-TC sharding on v7x
            vmem_limit_bytes=32 * 1024 * 1024,
        ),
    )(inv_db, user_data, item_data)


class Generator:
    """JAX/Pallas port of the PyTorch Generator module (forward pass only)."""

    def __init__(self, gen_batch_size, gen_dim_user, gen_dim_item, key):
        self.gen_batch_size = gen_batch_size
        self.gen_dim_user = gen_dim_user
        self.gen_dim_item = gen_dim_item
        ku, ki = jax.random.split(key)
        # torch.rand -> uniform [0, 1)
        self.user_data = jax.random.uniform(
            ku, (gen_batch_size, gen_dim_user), dtype=jnp.float32)
        self.item_data = jax.random.uniform(
            ki, (gen_batch_size, gen_dim_item), dtype=jnp.float32)

    def reset(self, key):
        ku, ki = jax.random.split(key)
        self.user_data = jax.random.uniform(
            ku, (self.gen_batch_size, self.gen_dim_user), dtype=jnp.float32)
        self.item_data = jax.random.uniform(
            ki, (self.gen_batch_size, self.gen_dim_item), dtype=jnp.float32)

    def forward(self, difficulty_balance=1):
        # Single fused, jitted pallas_call for both softmaxes.
        return _generator_forward(self.user_data, self.item_data,
                                  difficulty_balance)

    # TODO(synk): pretrain_target_labels / pretrain_distribution are training
    # loops over external teacher models + optimizers; not part of the forward
    # kernel and not reproduced here.


if __name__ == "__main__":
    # Small, deterministic example consistent with the module's __init__.
    gen_batch_size = 8
    gen_dim_user = 32
    gen_dim_item = 16

    key = jax.random.PRNGKey(0)
    gen = Generator(gen_batch_size, gen_dim_user, gen_dim_item, key)

    user_soft, item_soft = gen.forward(difficulty_balance=1)
    jax.block_until_ready(user_soft)
    jax.block_until_ready(item_soft)

    # Reference check against plain-JAX softmax. Tolerance is relaxed to cover
    # the approximate (EUP vrcp) reciprocal used for the softmax denominator.
    TOL = dict(atol=3e-3, rtol=1e-3)
    ref_user = jax.nn.softmax(gen.user_data / 1.0, axis=1)
    ref_item = jax.nn.softmax(gen.item_data / 1.0, axis=1)
    assert jnp.allclose(user_soft, ref_user, **TOL), "user softmax mismatch"
    assert jnp.allclose(item_soft, ref_item, **TOL), "item softmax mismatch"
    assert jnp.allclose(jnp.sum(user_soft, axis=1), 1.0, **TOL)
    assert jnp.allclose(jnp.sum(item_soft, axis=1), 1.0, **TOL)

    # Also exercise a non-trivial difficulty_balance.
    u2, i2 = gen.forward(difficulty_balance=2.0)
    jax.block_until_ready(u2)
    jax.block_until_ready(i2)
    assert jnp.allclose(u2, jax.nn.softmax(gen.user_data / 2.0, axis=1), **TOL)
    assert jnp.allclose(i2, jax.nn.softmax(gen.item_data / 2.0, axis=1), **TOL)

    print("KERNEL_OK")
</pallas_src>

<mosaic_0001>
module attributes {stable_mosaic.version = 11 : i64} {
  func.func @_fused_softmax_kernel(%arg0: i32, %arg1: memref<1xf32, #tpu.memory_space<smem>>, %arg2: memref<8x32xf32, #tpu.memory_space<vmem>>, %arg3: memref<8x16xf32, #tpu.memory_space<vmem>>, %arg4: memref<8x32xf32, #tpu.memory_space<vmem>>, %arg5: memref<8x16xf32, #tpu.memory_space<vmem>>) attributes {dimension_semantics = [#tpu.dimension_semantics<parallel>], iteration_bounds = array<i64: 1>, scalar_prefetch = 0 : i64, scratch_operands = 0 : i64, tpu.core_type = #tpu.core_type<tc>, window_params = [{transform_indices = @transform_0, window_bounds = array<i64: 1>}, {transform_indices = @transform_1, window_bounds = array<i64: 8, 32>}, {transform_indices = @transform_2, window_bounds = array<i64: 8, 16>}, {transform_indices = @transform_3, window_bounds = array<i64: 8, 32>}, {transform_indices = @transform_4, window_bounds = array<i64: 8, 16>}]} {
    %c0 = arith.constant 0 : index
    %0 = memref.load %arg1[%c0] : memref<1xf32, #tpu.memory_space<smem>>
    %c0_0 = arith.constant 0 : index
    %c0_1 = arith.constant 0 : index
    %1 = vector.load %arg2[%c0_0, %c0_1] : memref<8x32xf32, #tpu.memory_space<vmem>>, vector<8x32xf32>
    %cst = arith.constant dense<0xFF800000> : vector<8xf32>
    %2 = vector.multi_reduction <maximumf>, %1, %cst [1] : vector<8x32xf32> to vector<8xf32>
    %3 = vector.shape_cast %2 : vector<8xf32> to vector<8x1xf32>
    %4 = vector.broadcast %3 : vector<8x1xf32> to vector<8x32xf32>
    %5 = arith.subf %1, %4 : vector<8x32xf32>
    %6 = vector.broadcast %0 : f32 to vector<8x32xf32>
    %7 = arith.mulf %5, %6 : vector<8x32xf32>
    %8 = math.exp %7 : vector<8x32xf32>
    %cst_2 = arith.constant dense<0.000000e+00> : vector<8xf32>
    %9 = vector.multi_reduction <add>, %8, %cst_2 [1] : vector<8x32xf32> to vector<8xf32>
    %10 = vector.shape_cast %9 : vector<8xf32> to vector<8x1xf32>
    %11 = tpu.reciprocal %10 {approx = true} : vector<8x1xf32> -> vector<8x1xf32>
    %12 = vector.broadcast %11 : vector<8x1xf32> to vector<8x32xf32>
    %13 = arith.mulf %8, %12 : vector<8x32xf32>
    %c0_3 = arith.constant 0 : index
    %c0_4 = arith.constant 0 : index
    %14 = vector.load %arg4[%c0_3, %c0_4] : memref<8x32xf32, #tpu.memory_space<vmem>>, vector<8x32xf32>
    tpu.vector_store %arg4[%c0_3, %c0_4], %13 {strides = array<i32>} : memref<8x32xf32, #tpu.memory_space<vmem>>, vector<8x32xf32>,
    %c0_5 = arith.constant 0 : index
    %c0_6 = arith.constant 0 : index
    %15 = vector.load %arg3[%c0_5, %c0_6] : memref<8x16xf32, #tpu.memory_space<vmem>>, vector<8x16xf32>
    %cst_7 = arith.constant dense<0xFF800000> : vector<8xf32>
    %16 = vector.multi_reduction <maximumf>, %15, %cst_7 [1] : vector<8x16xf32> to vector<8xf32>
    %17 = vector.shape_cast %16 : vector<8xf32> to vector<8x1xf32>
    %18 = vector.broadcast %17 : vector<8x1xf32> to vector<8x16xf32>
    %19 = arith.subf %15, %18 : vector<8x16xf32>
    %20 = vector.broadcast %0 : f32 to vector<8x16xf32>
    %21 = arith.mulf %19, %20 : vector<8x16xf32>
    %22 = math.exp %21 : vector<8x16xf32>
    %cst_8 = arith.constant dense<0.000000e+00> : vector<8xf32>
    %23 = vector.multi_reduction <add>, %22, %cst_8 [1] : vector<8x16xf32> to vector<8xf32>
    %24 = vector.shape_cast %23 : vector<8xf32> to vector<8x1xf32>
    %25 = tpu.reciprocal %24 {approx = true} : vector<8x1xf32> -> vector<8x1xf32>
    %26 = vector.broadcast %25 : vector<8x1xf32> to vector<8x16xf32>
    %27 = arith.mulf %22, %26 : vector<8x16xf32>
    %c0_9 = arith.constant 0 : index
    %c0_10 = arith.constant 0 : index
    %28 = vector.load %arg5[%c0_9, %c0_10] : memref<8x16xf32, #tpu.memory_space<vmem>>, vector<8x16xf32>
    tpu.vector_store %arg5[%c0_9, %c0_10], %27 {strides = array<i32>} : memref<8x16xf32, #tpu.memory_space<vmem>>, vector<8x16xf32>,
    return
  }
  func.func @transform_0(%arg0: i32) -> i32 {
    %c0_i32 = arith.constant 0 : i32
    %c0_i32_0 = arith.constant 0 : i32
    return %c0_i32 : i32
  }
  func.func @transform_1(%arg0: i32) -> (i32, i32) {
    %c0_i32 = arith.constant 0 : i32
    %c0_i32_0 = arith.constant 0 : i32
    return %arg0, %c0_i32 : i32, i32
  }
  func.func @transform_2(%arg0: i32) -> (i32, i32) {
    %c0_i32 = arith.constant 0 : i32
    %c0_i32_0 = arith.constant 0 : i32
    return %arg0, %c0_i32 : i32, i32
  }
  func.func @transform_3(%arg0: i32) -> (i32, i32) {
    %c0_i32 = arith.constant 0 : i32
    %c0_i32_0 = arith.constant 0 : i32
    return %arg0, %c0_i32 : i32, i32
  }
  func.func @transform_4(%arg0: i32) -> (i32, i32) {
    %c0_i32 = arith.constant 0 : i32
    %c0_i32_0 = arith.constant 0 : i32
    return %arg0, %c0_i32 : i32, i32
  }
}

</mosaic_0001>

<bundles_post_ra>
// kernel: _generator_forward.1
= control target key start
LH: loop header
LB: loop body
LE: loop exit
PB: predicated region body
PF: predicated region fallthrough
CT: control target
= control target key end

     0   :  { %11 = vsyncpa [#allocation4], 0  ;;  %s236_s0 = inlined_call_operand.<no memory space> [shape: f32[1], index: 0, kind: input, shape index: {}]   ;;  %s237_s1 = inlined_call_operand.hbm [shape: f32[8,32], index: 1, kind: input, shape index: {}]   ;;  %s238_s2 = inlined_call_operand.vmem [shape: f32[8,16], index: 2, kind: input, shape index: {}]   ;;  %s239_s3 = inlined_call_operand.hbm [shape: f32[8,32], index: 3, kind: output, shape index: {0}]   ;;  %s240_s4 = inlined_call_operand.hbm [shape: f32[8,16], index: 4, kind: output, shape index: {1}]  }
   0x1   :  { %12 = vsyncpa [#allocation5], 0 }
   0x2   :  { %13 = vsyncpa [#allocation8], 0  ;;  %s21_s17 = sshll.u32 %s237_s1, 4  ;;  %s187_s18 = smov [#allocation3]   ;;  %s22_s17 = int_to_ptr.hbm [resolvable:$true] %s21_s17 }
   0x3   :  { %s23_s19 = sshll.u32 %s187_s18, 4  ;;  %s24_s19 = int_to_ptr.vmem [resolvable:$true] %s23_s19 }
   0x4   :  { %26 = dma.hbm_to_vmem [thread:$0]  %s22_s17, 128, %s24_s19, [#allocation4]  }
   0x5   :  { %181 = dma.done.wait [#allocation4], 128  }
   0x6   :  { %182 = vsyncadd [#allocation4], 4294967168  ;;  %vm35_vm0 = vcmask 261120   ;;  %v34_v0 = vld [vmem:[#allocation3] sm:$0xff]  ;;  %vm51_vm1 = vcmask 130048   ;;  %v40_v4 = vstv %s236_s0  ;;  %s188_s0 = smov [#allocation6]  }
   0x7   :  { %v36_v1 = vsel %vm35_vm0, %v34_v0, -inf  ;;  %v50_v2 = vld [vmem:[%s238_s2] sm:$0xff]  ;;  %s70_s2 = sshll.u32 %s188_s0, 4  ;;  %s72_s25 = sshll.u32 %s239_s3, 4  ;;  %s71_s2 = int_to_ptr.vmem [resolvable:$true] %s70_s2  ;;  %s73_s25 = int_to_ptr.hbm [resolvable:$true] %s72_s25 }
   0x8   :  { %37 = vmax.xlane.f32.xlu0 %v36_v1  ;;  %v52_v3 = vsel %vm51_vm1, %v50_v2, -inf  ;;  %s189_s26 = smov [#allocation7]   ;;  %s83_s30 = sshll.u32 %s240_s4, 4  ;;  %s84_s30 = int_to_ptr.hbm [resolvable:$true] %s83_s30 }
   0x9   :  { %s81_s27 = sshll.u32 %s189_s26, 4  ;;  %s82_s27 = int_to_ptr.vmem [resolvable:$true] %s81_s27 }
  0x10   :  { %53 = vmax.xlane.f32.xlu0 %v52_v3 }
  0x7b   :  { %v38_v5 = vpop.xlane.xlu0 %37 }
  0x7c   :  { %v39_v6 = vsub.f32 %v34_v0, %v38_v5 }
  0x7e   :  { %v41_v7 = vmul.f32 %v40_v4, %v39_v6 }
  0x80   :  { %v42_v8 = vmul.f32 1.442695, %v41_v7 }
  0x82   :  { %101 = vpow2.f32 %v42_v8 }
  0x83   :  { %v54_v9 = vpop.xlane.xlu0 %53 }
  0x84   :  { %v55_v10 = vsub.f32 %v50_v2, %v54_v9 }
  0x86   :  { %v56_v11 = vmul.f32 %v55_v10, %v40_v4 }
  0x88   :  { %v102_v12 = vpop.eup %101  ;;  %v57_v13 = vmul.f32 1.442695, %v56_v11 }
  0x89   :  { %v44_v14 = vsel %vm35_vm0, %v102_v12, 0.0 }
  0x8a   :  { %103 = vpow2.f32 %v57_v13  ;;  %45 = vadd.xlane.f32.xlu1 %v44_v14 }
  0x90   :  { %v104_v15 = vpop.eup %103 }
  0x91   :  { %v59_v16 = vsel %vm51_vm1, %v104_v15, 0.0 }
  0x92   :  { %60 = vadd.xlane.f32.xlu1 %v59_v16 }
  0xfd   :  { %v46_v17 = vpop.xlane.xlu1 %45 }
  0xfe   :  { %105 = vrcp.f32 %v46_v17 }
 0x104   :  { %v106_v18 = vpop.eup %105 }
 0x105   :  { %v48_v19 = vmul.f32 %v106_v18, %v102_v12  ;;  %v61_v20 = vpop.xlane.xlu1 %60 }
 0x106   :  { %107 = vrcp.f32 %v61_v20 }
 0x107   :  { %49 = vst.msk [vmem:[#allocation6] sm:$0xff] %vm35_vm0, %v48_v19 }
 0x108   :  { %75 = dma.vmem_to_hbm [thread:$0]  %s71_s2, 128, %s73_s25, [#allocation5]  }
 0x10c   :  { %v108_v21 = vpop.eup %107 }
 0x10d   :  { %v63_v22 = vmul.f32 %v108_v21, %v104_v15 }
 0x10f   :  { %64 = vst.msk [vmem:[#allocation7] sm:$0xff] %vm51_vm1, %v63_v22 }
 0x110   :  { %86 = dma.vmem_to_hbm [thread:$0]  %s82_s27, 128, %s84_s30, [#allocation8]  }
 0x111   :  { %183 = dma.done.wait [#allocation5], 128  }
 0x112   :  { %184 = vsyncadd [#allocation5], 4294967168 }
 0x113   :  { %185 = dma.done.wait [#allocation8], 128  }
 0x114   :  { %186 = vsyncadd [#allocation8], 4294967168 }
 0x115   :  { %95 = vsyncpa [#allocation4], 1 }
 0x116   :  { %96 = vsyncpa [#allocation5], 1 }
 0x117   :  { %97 = vsyncpa [#allocation8], 1 }

</bundles_post_ra>
